<compile_context>
chip_gen: v6e
topology: v6e:2x2x1
jax: 0.10.0
libtpu: 0.0.40
codegen_flags: <defaults>
</compile_context>

<pallas_src>
from functools import partial

import jax
import jax.numpy as jnp
from jax.experimental import pallas as pl
from jax.experimental.pallas import tpu as pltpu

_NUM_ACC = 4  # partial accumulators to break the serial mul/add dependency chain


def _conv2d_kernel(x_ref, w_ref, b_ref, o_ref, *, n, c_in, c_out, kh, kw,
                   sh, sw, dh, dw, h_out, w_out):
    """Direct (VPU) conv on a stride-phase-split, zero-padded input.

    x_ref: (sh*sw*c_in*n, Hq, Wq) VMEM   phase-split padded input (f32)
    w_ref: (c_out*c_in*kh*kw,)    SMEM   flat f32 filter taps
    b_ref: (c_out,)               SMEM   flat f32 bias
    o_ref: (n, c_out, h_out, w_out) VMEM NCHW output
    """
    for co in range(c_out):
        accs = [None] * _NUM_ACC
        tap = 0
        for ci in range(c_in):
            for i in range(kh):
                r0 = i * dh
                ph_h, hq0 = r0 % sh, r0 // sh
                for j in range(kw):
                    c0 = j * dw
                    ph_w, wq0 = c0 % sw, c0 // sw
                    base = ((ph_h * sw + ph_w) * c_in + ci) * n
                    # static, unit-stride slice covering all batch elements
                    patch = x_ref[base:base + n,
                                  hq0:hq0 + h_out,
                                  wq0:wq0 + w_out]            # (n, h_out, w_out)
                    widx = ((co * c_in + ci) * kh + i) * kw + j
                    t = w_ref[widx] * patch
                    slot = tap % _NUM_ACC
                    if accs[slot] is None:
                        if slot == 0:
                            t = t + b_ref[co]   # fold bias into the first tap
                        accs[slot] = t
                    else:
                        accs[slot] = accs[slot] + t
                    tap += 1
        live = [a for a in accs if a is not None]
        while len(live) > 1:                      # pairwise tree reduction
            nxt = [live[k] + live[k + 1] for k in range(0, len(live) - 1, 2)]
            if len(live) % 2:
                nxt.append(live[-1])
            live = nxt
        o_ref[:, co, :, :] = live[0].astype(o_ref.dtype)


@partial(jax.jit, static_argnames=("stride", "padding", "dilation"))
def conv2d_pallas(x, weight, bias=None, *, stride=(2, 2), padding=(1, 1),
                  dilation=(1, 1)):
    n, c_in, h, w = x.shape
    c_out, c_in_w, kh, kw = weight.shape
    assert c_in == c_in_w, "groups != 1 not supported"
    sh, sw = stride
    ph, pw = padding
    dh, dw = dilation
    h_out = (h + 2 * ph - dh * (kh - 1) - 1) // sh + 1
    w_out = (w + 2 * pw - dw * (kw - 1) - 1) // sw + 1
    if bias is None:
        bias = jnp.zeros((c_out,), jnp.float32)

    # per-phase spatial extents (cover both the padded extent and the largest
    # in-phase window any tap will read)
    hq = max(-(-(h + 2 * ph) // sh), (dh * (kh - 1)) // sh + h_out)
    wq = max(-(-(w + 2 * pw) // sw), (dw * (kw - 1)) // sw + w_out)
    hp_t, wp_t = sh * hq, sw * wq

    # zero pad ('zeros' padding mode) then split rows/cols by stride phase so
    # every in-kernel tap slice is unit stride.  Under jit this is one small
    # fusion feeding the pallas call (no separate dispatches).
    x_pad = jnp.pad(x.astype(jnp.float32),
                    ((0, 0), (0, 0), (ph, hp_t - h - ph), (pw, wp_t - w - pw)))
    x_re = x_pad.reshape(n, c_in, hq, sh, wq, sw)
    x_re = x_re.transpose(3, 5, 1, 0, 2, 4)          # (sh, sw, c_in, n, hq, wq)
    x_re = x_re.reshape(sh * sw * c_in * n, hq, wq)

    w_flat = weight.reshape(-1).astype(jnp.float32)   # small 1-D SMEM table
    b_flat = bias.reshape(-1).astype(jnp.float32)

    kernel = partial(
        _conv2d_kernel,
        n=n, c_in=c_in, c_out=c_out, kh=kh, kw=kw,
        sh=sh, sw=sw, dh=dh, dw=dw, h_out=h_out, w_out=w_out,
    )

    itemsize = jnp.dtype(x.dtype).itemsize
    out_bytes = n * c_out * h_out * w_out * itemsize
    in_bytes = (x_re.size + w_flat.size + b_flat.size) * 4
    cost = pl.CostEstimate(
        flops=2 * n * c_out * h_out * w_out * c_in * kh * kw,
        transcendentals=0,
        bytes_accessed=in_bytes + out_bytes,
    )

    return pl.pallas_call(
        kernel,
        out_shape=jax.ShapeDtypeStruct((n, c_out, h_out, w_out), x.dtype),
        in_specs=[
            pl.BlockSpec(memory_space=pltpu.MemorySpace.VMEM),   # phase-split input
            pl.BlockSpec(memory_space=pltpu.MemorySpace.SMEM),   # flat weights
            pl.BlockSpec(memory_space=pltpu.MemorySpace.SMEM),   # flat bias
        ],
        out_specs=pl.BlockSpec(memory_space=pltpu.MemorySpace.VMEM),
        cost_estimate=cost,
    )(x_re, w_flat, b_flat)


if __name__ == "__main__":
    # Test-module defaults: in_channels=2, out_channels=1, kernel=(3,3),
    # stride=(2,2), padding=(1,1), dilation=(1,1), groups=1, bias=True,
    # height=width=8.  batches=2 to exercise the vectorized batch dimension.
    batches, c_in, c_out = 2, 2, 1
    h = w = 8
    kh = kw = 3
    stride, padding, dilation = (2, 2), (1, 1), (1, 1)

    key = jax.random.PRNGKey(0)
    kx, kw_, kb = jax.random.split(key, 3)
    x = jax.random.normal(kx, (batches, c_in, h, w), dtype=jnp.float32)
    fan_in = c_in * kh * kw
    bound = 1.0 / (fan_in ** 0.5)
    weight = jax.random.uniform(kw_, (c_out, c_in, kh, kw), jnp.float32,
                                minval=-bound, maxval=bound)
    bias = jax.random.uniform(kb, (c_out,), jnp.float32,
                              minval=-bound, maxval=bound)

    out = conv2d_pallas(x, weight, bias, stride=stride, padding=padding,
                        dilation=dilation)
    out = jax.block_until_ready(out)

    # reference (plain JAX, f32 precision) to validate semantics
    ref = jax.lax.conv_general_dilated(
        x, weight, window_strides=stride,
        padding=[(padding[0], padding[0]), (padding[1], padding[1])],
        rhs_dilation=dilation,
        dimension_numbers=("NCHW", "OIHW", "NCHW"),
        precision=jax.lax.Precision.HIGHEST,
    ) + bias.reshape(1, c_out, 1, 1)

    assert out.shape == (batches, c_out, 4, 4), out.shape
    assert jnp.allclose(out, ref, atol=1e-5, rtol=1e-5), "mismatch vs reference"
    print("KERNEL_OK")
</pallas_src>

<mosaic_0001>
module attributes {stable_mosaic.version = 11 : i64} {
  func.func @_conv2d_kernel(%arg0: memref<16x5x5xf32, #tpu.memory_space<vmem>>, %arg1: memref<18xf32, #tpu.memory_space<smem>>, %arg2: memref<1xf32, #tpu.memory_space<smem>>, %arg3: memref<2x1x4x4xf32, #tpu.memory_space<vmem>>) attributes {dimension_semantics = [], scalar_prefetch = 0 : i64, scratch_operands = 0 : i64, tpu.core_type = #tpu.core_type<tc>} {
    %c0 = arith.constant 0 : index
    %c0_0 = arith.constant 0 : index
    %c0_1 = arith.constant 0 : index
    %0 = vector.load %arg0[%c0, %c0_0, %c0_1] : memref<16x5x5xf32, #tpu.memory_space<vmem>>, vector<2x4x4xf32>
    %c0_2 = arith.constant 0 : index
    %1 = memref.load %arg1[%c0_2] : memref<18xf32, #tpu.memory_space<smem>>
    %2 = vector.broadcast %1 : f32 to vector<2x4x4xf32>
    %3 = arith.mulf %2, %0 : vector<2x4x4xf32>
    %c0_3 = arith.constant 0 : index
    %4 = memref.load %arg2[%c0_3] : memref<1xf32, #tpu.memory_space<smem>>
    %5 = vector.broadcast %4 : f32 to vector<2x4x4xf32>
    %6 = arith.addf %3, %5 : vector<2x4x4xf32>
    %c4 = arith.constant 4 : index
    %c0_4 = arith.constant 0 : index
    %c0_5 = arith.constant 0 : index
    %7 = vector.load %arg0[%c4, %c0_4, %c0_5] : memref<16x5x5xf32, #tpu.memory_space<vmem>>, vector<2x4x4xf32>
    %c1 = arith.constant 1 : index
    %8 = memref.load %arg1[%c1] : memref<18xf32, #tpu.memory_space<smem>>
    %9 = vector.broadcast %8 : f32 to vector<2x4x4xf32>
    %10 = arith.mulf %9, %7 : vector<2x4x4xf32>
    %c0_6 = arith.constant 0 : index
    %c0_7 = arith.constant 0 : index
    %c1_8 = arith.constant 1 : index
    %11 = vector.load %arg0[%c0_6, %c0_7, %c1_8] : memref<16x5x5xf32, #tpu.memory_space<vmem>>, vector<2x4x4xf32>
    %c2 = arith.constant 2 : index
    %12 = memref.load %arg1[%c2] : memref<18xf32, #tpu.memory_space<smem>>
    %13 = vector.broadcast %12 : f32 to vector<2x4x4xf32>
    %14 = arith.mulf %13, %11 : vector<2x4x4xf32>
    %c8 = arith.constant 8 : index
    %c0_9 = arith.constant 0 : index
    %c0_10 = arith.constant 0 : index
    %15 = vector.load %arg0[%c8, %c0_9, %c0_10] : memref<16x5x5xf32, #tpu.memory_space<vmem>>, vector<2x4x4xf32>
    %c3 = arith.constant 3 : index
    %16 = memref.load %arg1[%c3] : memref<18xf32, #tpu.memory_space<smem>>
    %17 = vector.broadcast %16 : f32 to vector<2x4x4xf32>
    %18 = arith.mulf %17, %15 : vector<2x4x4xf32>
    %c12 = arith.constant 12 : index
    %c0_11 = arith.constant 0 : index
    %c0_12 = arith.constant 0 : index
    %19 = vector.load %arg0[%c12, %c0_11, %c0_12] : memref<16x5x5xf32, #tpu.memory_space<vmem>>, vector<2x4x4xf32>
    %c4_13 = arith.constant 4 : index
    %20 = memref.load %arg1[%c4_13] : memref<18xf32, #tpu.memory_space<smem>>
    %21 = vector.broadcast %20 : f32 to vector<2x4x4xf32>
    %22 = arith.mulf %21, %19 : vector<2x4x4xf32>
    %23 = arith.addf %6, %22 : vector<2x4x4xf32>
    %c8_14 = arith.constant 8 : index
    %c0_15 = arith.constant 0 : index
    %c1_16 = arith.constant 1 : index
    %24 = vector.load %arg0[%c8_14, %c0_15, %c1_16] : memref<16x5x5xf32, #tpu.memory_space<vmem>>, vector<2x4x4xf32>
    %c5 = arith.constant 5 : index
    %25 = memref.load %arg1[%c5] : memref<18xf32, #tpu.memory_space<smem>>
    %26 = vector.broadcast %25 : f32 to vector<2x4x4xf32>
    %27 = arith.mulf %26, %24 : vector<2x4x4xf32>
    %28 = arith.addf %10, %27 : vector<2x4x4xf32>
    %c0_17 = arith.constant 0 : index
    %c1_18 = arith.constant 1 : index
    %c0_19 = arith.constant 0 : index
    %29 = vector.load %arg0[%c0_17, %c1_18, %c0_19] : memref<16x5x5xf32, #tpu.memory_space<vmem>>, vector<2x4x4xf32>
    %c6 = arith.constant 6 : index
    %30 = memref.load %arg1[%c6] : memref<18xf32, #tpu.memory_space<smem>>
    %31 = vector.broadcast %30 : f32 to vector<2x4x4xf32>
    %32 = arith.mulf %31, %29 : vector<2x4x4xf32>
    %33 = arith.addf %14, %32 : vector<2x4x4xf32>
    %c4_20 = arith.constant 4 : index
    %c1_21 = arith.constant 1 : index
    %c0_22 = arith.constant 0 : index
    %34 = vector.load %arg0[%c4_20, %c1_21, %c0_22] : memref<16x5x5xf32, #tpu.memory_space<vmem>>, vector<2x4x4xf32>
    %c7 = arith.constant 7 : index
    %35 = memref.load %arg1[%c7] : memref<18xf32, #tpu.memory_space<smem>>
    %36 = vector.broadcast %35 : f32 to vector<2x4x4xf32>
    %37 = arith.mulf %36, %34 : vector<2x4x4xf32>
    %38 = arith.addf %18, %37 : vector<2x4x4xf32>
    %c0_23 = arith.constant 0 : index
    %c1_24 = arith.constant 1 : index
    %c1_25 = arith.constant 1 : index
    %39 = vector.load %arg0[%c0_23, %c1_24, %c1_25] : memref<16x5x5xf32, #tpu.memory_space<vmem>>, vector<2x4x4xf32>
    %c8_26 = arith.constant 8 : index
    %40 = memref.load %arg1[%c8_26] : memref<18xf32, #tpu.memory_space<smem>>
    %41 = vector.broadcast %40 : f32 to vector<2x4x4xf32>
    %42 = arith.mulf %41, %39 : vector<2x4x4xf32>
    %43 = arith.addf %23, %42 : vector<2x4x4xf32>
    %c2_27 = arith.constant 2 : index
    %c0_28 = arith.constant 0 : index
    %c0_29 = arith.constant 0 : index
    %44 = vector.load %arg0[%c2_27, %c0_28, %c0_29] : memref<16x5x5xf32, #tpu.memory_space<vmem>>, vector<2x4x4xf32>
    %c9 = arith.constant 9 : index
    %45 = memref.load %arg1[%c9] : memref<18xf32, #tpu.memory_space<smem>>
    %46 = vector.broadcast %45 : f32 to vector<2x4x4xf32>
    %47 = arith.mulf %46, %44 : vector<2x4x4xf32>
    %48 = arith.addf %28, %47 : vector<2x4x4xf32>
    %c6_30 = arith.constant 6 : index
    %c0_31 = arith.constant 0 : index
    %c0_32 = arith.constant 0 : index
    %49 = vector.load %arg0[%c6_30, %c0_31, %c0_32] : memref<16x5x5xf32, #tpu.memory_space<vmem>>, vector<2x4x4xf32>
    %c10 = arith.constant 10 : index
    %50 = memref.load %arg1[%c10] : memref<18xf32, #tpu.memory_space<smem>>
    %51 = vector.broadcast %50 : f32 to vector<2x4x4xf32>
    %52 = arith.mulf %51, %49 : vector<2x4x4xf32>
    %53 = arith.addf %33, %52 : vector<2x4x4xf32>
    %c2_33 = arith.constant 2 : index
    %c0_34 = arith.constant 0 : index
    %c1_35 = arith.constant 1 : index
    %54 = vector.load %arg0[%c2_33, %c0_34, %c1_35] : memref<16x5x5xf32, #tpu.memory_space<vmem>>, vector<2x4x4xf32>
    %c11 = arith.constant 11 : index
    %55 = memref.load %arg1[%c11] : memref<18xf32, #tpu.memory_space<smem>>
    %56 = vector.broadcast %55 : f32 to vector<2x4x4xf32>
    %57 = arith.mulf %56, %54 : vector<2x4x4xf32>
    %58 = arith.addf %38, %57 : vector<2x4x4xf32>
    %c10_36 = arith.constant 10 : index
    %c0_37 = arith.constant 0 : index
    %c0_38 = arith.constant 0 : index
    %59 = vector.load %arg0[%c10_36, %c0_37, %c0_38] : memref<16x5x5xf32, #tpu.memory_space<vmem>>, vector<2x4x4xf32>
    %c12_39 = arith.constant 12 : index
    %60 = memref.load %arg1[%c12_39] : memref<18xf32, #tpu.memory_space<smem>>
    %61 = vector.broadcast %60 : f32 to vector<2x4x4xf32>
    %62 = arith.mulf %61, %59 : vector<2x4x4xf32>
    %63 = arith.addf %43, %62 : vector<2x4x4xf32>
    %c14 = arith.constant 14 : index
    %c0_40 = arith.constant 0 : index
    %c0_41 = arith.constant 0 : index
    %64 = vector.load %arg0[%c14, %c0_40, %c0_41] : memref<16x5x5xf32, #tpu.memory_space<vmem>>, vector<2x4x4xf32>
    %c13 = arith.constant 13 : index
    %65 = memref.load %arg1[%c13] : memref<18xf32, #tpu.memory_space<smem>>
    %66 = vector.broadcast %65 : f32 to vector<2x4x4xf32>
    %67 = arith.mulf %66, %64 : vector<2x4x4xf32>
    %68 = arith.addf %48, %67 : vector<2x4x4xf32>
    %c10_42 = arith.constant 10 : index
    %c0_43 = arith.constant 0 : index
    %c1_44 = arith.constant 1 : index
    %69 = vector.load %arg0[%c10_42, %c0_43, %c1_44] : memref<16x5x5xf32, #tpu.memory_space<vmem>>, vector<2x4x4xf32>
    %c14_45 = arith.constant 14 : index
    %70 = memref.load %arg1[%c14_45] : memref<18xf32, #tpu.memory_space<smem>>
    %71 = vector.broadcast %70 : f32 to vector<2x4x4xf32>
    %72 = arith.mulf %71, %69 : vector<2x4x4xf32>
    %73 = arith.addf %53, %72 : vector<2x4x4xf32>
    %c2_46 = arith.constant 2 : index
    %c1_47 = arith.constant 1 : index
    %c0_48 = arith.constant 0 : index
    %74 = vector.load %arg0[%c2_46, %c1_47, %c0_48] : memref<16x5x5xf32, #tpu.memory_space<vmem>>, vector<2x4x4xf32>
    %c15 = arith.constant 15 : index
    %75 = memref.load %arg1[%c15] : memref<18xf32, #tpu.memory_space<smem>>
    %76 = vector.broadcast %75 : f32 to vector<2x4x4xf32>
    %77 = arith.mulf %76, %74 : vector<2x4x4xf32>
    %78 = arith.addf %58, %77 : vector<2x4x4xf32>
    %c6_49 = arith.constant 6 : index
    %c1_50 = arith.constant 1 : index
    %c0_51 = arith.constant 0 : index
    %79 = vector.load %arg0[%c6_49, %c1_50, %c0_51] : memref<16x5x5xf32, #tpu.memory_space<vmem>>, vector<2x4x4xf32>
    %c16 = arith.constant 16 : index
    %80 = memref.load %arg1[%c16] : memref<18xf32, #tpu.memory_space<smem>>
    %81 = vector.broadcast %80 : f32 to vector<2x4x4xf32>
    %82 = arith.mulf %81, %79 : vector<2x4x4xf32>
    %83 = arith.addf %63, %82 : vector<2x4x4xf32>
    %c2_52 = arith.constant 2 : index
    %c1_53 = arith.constant 1 : index
    %c1_54 = arith.constant 1 : index
    %84 = vector.load %arg0[%c2_52, %c1_53, %c1_54] : memref<16x5x5xf32, #tpu.memory_space<vmem>>, vector<2x4x4xf32>
    %c17 = arith.constant 17 : index
    %85 = memref.load %arg1[%c17] : memref<18xf32, #tpu.memory_space<smem>>
    %86 = vector.broadcast %85 : f32 to vector<2x4x4xf32>
    %87 = arith.mulf %86, %84 : vector<2x4x4xf32>
    %88 = arith.addf %68, %87 : vector<2x4x4xf32>
    %89 = arith.addf %83, %88 : vector<2x4x4xf32>
    %90 = arith.addf %73, %78 : vector<2x4x4xf32>
    %91 = arith.addf %89, %90 : vector<2x4x4xf32>
    %c0_55 = arith.constant 0 : index
    %c0_56 = arith.constant 0 : index
    %c0_57 = arith.constant 0 : index
    %c0_58 = arith.constant 0 : index
    %92 = vector.load %arg3[%c0_55, %c0_56, %c0_57, %c0_58] : memref<2x1x4x4xf32, #tpu.memory_space<vmem>>, vector<2x1x4x4xf32>
    %93 = vector.shape_cast %92 : vector<2x1x4x4xf32> to vector<2x4x4xf32>
    %94 = vector.shape_cast %91 : vector<2x4x4xf32> to vector<2x1x4x4xf32>
    tpu.vector_store %arg3[%c0_55, %c0_56, %c0_57, %c0_58], %94 {strides = array<i32>} : memref<2x1x4x4xf32, #tpu.memory_space<vmem>>, vector<2x1x4x4xf32>,
    return
  }
}

</mosaic_0001>

<bundles_post_ra>
// kernel: conv2d_pallas.1
= control target key start
LH: loop header
LB: loop body
LE: loop exit
PB: predicated region body
PF: predicated region fallthrough
CT: control target
= control target key end

     0   :  { %9 = vsyncpa [#allocation5], 0  ;;  %s485_s0 = inlined_call_operand.vmem [shape: f32[16,5,5], index: 0, kind: input, shape index: {}]   ;;  %s486_s1 = inlined_call_operand.vmem [shape: f32[18], index: 1, kind: input, shape index: {}]   ;;  %s487_s2 = inlined_call_operand.<no memory space> [shape: f32[1], index: 2, kind: input, shape index: {}]   ;;  %s488_s3 = inlined_call_operand.hbm [shape: f32[2,1,4,4], index: 3, kind: output, shape index: {}]  }
   0x1   :  { %10 = vsyncpa [#allocation4], 0  ;;  %s19_s14 = sshll.u32 %s486_s1, 4  ;;  %s20_s14 = int_to_ptr.vmem [resolvable:$true] %s19_s14 }
   0x2   :  { %s297_s15 = scalar_lea.vmem %s20_s14, 16  ;;  %p302_p1 = scmp.lt.s32.totalorder %s20_s14, %s20_s14 }
   0x3   :  { %p298_p0 = scmp.ne.s32.totalorder %s20_s14, %s297_s15  ;;  %p303_p2 = scmp.lt.s32.totalorder %s297_s15, %s297_s15 }
   0x5   :  { %p304_p3 = por %p303_p2, %p302_p1 }
   0x7   :  { %p305_p4 = pnand %p304_p3, %p298_p0 }
   0x9   :  { %308 = shalt.err (!%p305_p4)
}
   0xa   :  { %s333_s16 = smov [#allocation3]  }
   0xb   :  { %22 = dma.vmem_to_smem %s20_s14, 16, %s333_s16, [#allocation5]  }
   0xc   :  { %329 = dma.done.wait [#allocation5], 16  }
   0xd   :  { %330 = vsyncadd [#allocation5], 4294967280 }
   0xe   :  { %28 = sfence }
   0xf   :  { %s276_s17 = sld [smem:[#allocation3 + $0xb]]  ;;  %v365_v0 = vld [vmem:[%s485_s0 + $0x10] sm:$0xf]  ;;  %v80_v1 = vld [vmem:[%s485_s0 + $0x1] sm:$0xf]  ;;  %s334_s27 = smov 127  }
  0x10   :  { %s265_s18 = sld [smem:[#allocation3 + $0x6]]  ;;  %v373_v2 = vld [vmem:[%s485_s0 + $0x18] sm:$0xf]  ;;  %v81_v5 = vld [vmem:[%s485_s0 + $0x9] sm:$0xf]  ;;  %s335_s28 = smov 1  }
  0x11   :  { %s275_s19 = sld [smem:[#allocation3 + $0xa]]  ;;  %v273_v10 = vld [vmem:[%s485_s0 + $0x30] sm:$0xf]  ;;  %v274_v12 = vld [vmem:[%s485_s0 + $0x38] sm:$0xf]  ;;  %vm234_vm0 = vcmask 27648  }
  0x12   :  { %s268_s6 = sld [smem:[#allocation3 + $0x7]]  ;;  %v266_v15 = vld [vmem:[%s485_s0 + $0x21] sm:$0xf]  ;;  %v267_v21 = vld [vmem:[%s485_s0 + $0x29] sm:$0xf]  ;;  %s336_s30 = smov [#allocation6]  }
  0x13   :  { %s260_s7 = sld [smem:[#allocation3 + $0x3]]  ;;  %v258_v17 = vld [vmem:[%s485_s0 + $0x40] sm:$0xf]  ;;  %v259_v22 = vld [vmem:[%s485_s0 + $0x48] sm:$0xf] }
  0x14   :  { %s286_s8 = sld [smem:[#allocation3 + $0xf]]  ;;  %v284_v23 = vld [vmem:[%s485_s0 + $0x11] sm:$0xf]  ;;  %v285_v30 = vld [vmem:[%s485_s0 + $0x19] sm:$0xf] }
  0x15   :  { %v145_v3 = vstv %s276_s17  ;;  %s264_s17 = sld [smem:[#allocation3 + $0x5]]  ;;  %v29_v48 = vld [vmem:[%s485_s0] sm:$0xf]  ;;  %v30_v51 = vld [vmem:[%s485_s0 + $0x8] sm:$0xf] }
  0x16   :  { %v146_v4 = vmul.f32 %v365_v0, %v145_v3  ;;  %v83_v6 = vstv %s265_s18  ;;  %v147_v8 = vmul.f32 %v373_v2, %v145_v3  ;;  %s269_s20 = sld [smem:[#allocation3 + $0x8]]  ;;  %v277_v56 = vld [vmem:[%s485_s0 + $0x50] sm:$0xf]  ;;  %v278_v63 = vld [vmem:[%s485_s0 + $0x58] sm:$0xf] }
  0x17   :  { %v84_v7 = vmul.f32 %v83_v6, %v80_v1  ;;  %v85_v9 = vmul.f32 %v83_v6, %v81_v5  ;;  %v131_v11 = vstv %s275_s19  ;;  %s290_s22 = sld [smem:[#allocation3 + $0x11]]  ;;  %v254_v3 = vld [vmem:[%s485_s0 + $0x20] sm:$0xf] }
  0x18   :  { %150 = vrot.lane.b32.xlu0 %v146_v4, %s334_s27  ;;  %v132_v13 = vmul.f32 %v273_v10, %v131_v11  ;;  %v133_v14 = vmul.f32 %v274_v12, %v131_v11  ;;  %v99_v16 = vstv %s268_s6  ;;  %s257_s23 = sld [smem:[#allocation3 + $0x2]] }
  0x19   :  { %88 = vrot.lane.b32.xlu1 %v84_v7, %s335_s28  ;;  %v54_v18 = vstv %s260_s7  ;;  %v100_v19 = vmul.f32 %v266_v15, %v99_v16  ;;  %v101_v26 = vmul.f32 %v267_v21, %v99_v16  ;;  %s283_s26 = sld [smem:[#allocation3 + $0xe]]  ;;  %v36_v7 = vstv %s487_s2 }
  0x1a   :  { %v55_v20 = vmul.f32 %v258_v17, %v54_v18  ;;  %v185_v24 = vstv %s286_s8  ;;  %v56_v27 = vmul.f32 %v259_v22, %v54_v18  ;;  %s426_s4 = sld [smem:[#allocation3 + $0x1]]  ;;  %v262_v18 = vld [vmem:[%s485_s0 + $0x68] sm:$0xf] }
  0x1b   :  { %v186_v28 = vmul.f32 %v284_v23, %v185_v24  ;;  %v67_v33 = vstv %s264_s17  ;;  %v187_v35 = vmul.f32 %v285_v30, %v185_v24  ;;  %s428_s5 = sld [smem:[#allocation3 + $0x4]] }
  0x1c   :  { %152 = vrot.lane.b32.xlu0 %v147_v8, %s334_s27  ;;  %v102_v25 = vadd.f32 %v100_v19, %v55_v20  ;;  %v103_v32 = vadd.f32 %v101_v26, %v56_v27  ;;  %v68_v38 = vmul.f32 %v258_v17, %v67_v33  ;;  %v105_v39 = vstv %s269_s20  ;;  %s430_s6 = sld [smem:[#allocation3 + $0x9]]  ;;  %v280_v19 = vld [vmem:[%s485_s0 + $0x70] sm:$0xf] }
  0x1d   :  { %90 = vrot.lane.b32.xlu1 %v85_v9, %s335_s28  ;;  %v106_v41 = vmul.f32 %v105_v39, %v80_v1  ;;  %v69_v42 = vmul.f32 %v259_v22, %v67_v33  ;;  %v199_v43 = vstv %s290_s22  ;;  %v107_v44 = vmul.f32 %v105_v39, %v81_v5  ;;  %s436_s9 = sld [smem:[#allocation3 + $0xd]]  ;;  %v261_v5 = vld [vmem:[%s485_s0 + $0x60] sm:$0xf] }
  0x1e   :  { %v200_v45 = vmul.f32 %v284_v23, %v199_v43  ;;  %v201_v46 = vmul.f32 %v285_v30, %v199_v43  ;;  %v47_v49 = vstv %s257_s23  ;;  %s441_s12 = sld [smem:[#allocation3 + $0xc]] }
  0x1f   :  { %v48_v50 = vmul.f32 %v47_v49, %v29_v48  ;;  %v49_v54 = vmul.f32 %v47_v49, %v30_v51  ;;  %v177_v57 = vstv %s283_s26  ;;  %s454_s19 = sld [smem:[#allocation3 + $0x10]] }
  0x20   :  { %136 = vrot.lane.b32.xlu0 %v132_v13, %s335_s28  ;;  %v178_v61 = vmul.f32 %v277_v56, %v177_v57  ;;  %v43_v4 = vstv %s426_s4  ;;  %v179_v10 = vmul.f32 %v278_v63, %v177_v57  ;;  %v288_v57 = vld [vmem:[%s485_s0 + $0x39] sm:$0xf]  ;;  %s242_s4 = sshll.u32 %s336_s30, 4  ;;  %s243_s4 = int_to_ptr.vmem [resolvable:$true] %s242_s4 }
  0x21   :  { %138 = vrot.lane.b32.xlu1 %v133_v14, %s335_s28  ;;  %v61_v6 = vstv %s428_s5  ;;  %v44_v15 = vmul.f32 %v254_v3, %v43_v4  ;;  %s309_s5 = scalar_lea.vmem %s243_s4, 128  ;;  %p314_p6 = scmp.lt.s32.totalorder %s243_s4, %s243_s4 }
  0x22   :  { %v122_v11 = vstv %s430_s6  ;;  %v62_v16 = vmul.f32 %v261_v5, %v61_v6  ;;  %v63_v26 = vmul.f32 %v262_v18, %v61_v6  ;;  %p310_p5 = scmp.ne.s32.totalorder %s243_s4, %s309_s5  ;;  %p315_p7 = scmp.lt.s32.totalorder %s309_s5, %s309_s5 }
  0x23   :  { %v171_v20 = vstv %s436_s9  ;;  %v123_v21 = vmul.f32 %v365_v0, %v122_v11 }
  0x24   :  { %p316_p8 = por %p315_p7, %p314_p6 }
  0x25   :  { %v193_v33 = vstv %s454_s19 }
  0x26   :  { %p317_p9 = pnand %p316_p8, %p310_p5 }
  0x8a   :  { %v151_v29 = vpop.permute.xlu0 %150 }
  0x8b   :  { %v156_v31 = vadd.f32 %v151_v29, %v102_v25  ;;  %v89_v47 = vpop.permute.xlu1 %88  ;;  %v162_v25 = vstv %s441_s12 }
  0x8c   :  { %v94_v53 = vadd.f32 %v89_v47, %v48_v50  ;;  %v255_v50 = vld [vmem:[%s485_s0 + $0x28] sm:$0xf] }
  0x8d   :  { %v188_v34 = vadd.f32 %v186_v28, %v156_v31  ;;  %v172_v31 = vmul.f32 %v280_v19, %v171_v20 }
  0x8e   :  { %v153_v36 = vpop.permute.xlu0 %152 }
  0x8f   :  { %v157_v37 = vadd.f32 %v153_v36, %v103_v32  ;;  %216 = vrot.lane.b32.xlu0 %v188_v34, %s335_s28  ;;  %v91_v52 = vpop.permute.xlu1 %90  ;;  %v287_v32 = vld [vmem:[%s485_s0 + $0x31] sm:$0xf]  ;;  %v163_v34 = vmul.f32 %v277_v56, %v162_v25 }
  0x90   :  { %v95_v59 = vadd.f32 %v91_v52, %v49_v54  ;;  %v124_v52 = vmul.f32 %v373_v2, %v122_v11  ;;  %v281_v54 = vld [vmem:[%s485_s0 + $0x78] sm:$0xf] }
  0x91   :  { %v189_v40 = vadd.f32 %v187_v35, %v157_v37  ;;  %v173_v56 = vmul.f32 %v281_v54, %v171_v20 }
  0x92   :  { %v137_v55 = vpop.permute.xlu0 %136 }
  0x93   :  { %218 = vrot.lane.b32.xlu1 %v189_v40, %s335_s28  ;;  %72 = vrot.lane.b32.xlu0 %v68_v38, %s334_s27  ;;  %s421_s28 = sld [smem:[#allocation3]]  ;;  %v142_v60 = vadd.f32 %v137_v55, %v94_v53  ;;  %v139_v62 = vpop.permute.xlu1 %138  ;;  %v194_v40 = vmul.f32 %v287_v32, %v193_v33 }
  0x94   :  { %v143_v8 = vadd.f32 %v139_v62, %v95_v59  ;;  %v195_v59 = vmul.f32 %v288_v57, %v193_v33 }
  0x95   :  { %v180_v9 = vadd.f32 %v178_v61, %v142_v60 }
  0x96   :  { %v181_v22 = vadd.f32 %v179_v10, %v143_v8 }
  0x97   :  { %74 = vrot.lane.b32.xlu1 %v69_v42, %s334_s27  ;;  %110 = vrot.lane.b32.xlu0 %v106_v41, %s334_s27  ;;  %v164_v42 = vmul.f32 %v278_v63, %v162_v25 }
  0x99   :  { %v32_v58 = vstv %s421_s28 }
  0x9a   :  { %v33_v1 = vmul.f32 %v32_v58, %v29_v48  ;;  %v34_v12 = vmul.f32 %v32_v58, %v30_v51  ;;  %v45_v51 = vmul.f32 %v255_v50, %v43_v4 }
  0x9b   :  { %112 = vrot.lane.b32.xlu1 %v107_v44, %s334_s27  ;;  %204 = vrot.lane.b32.xlu0 %v200_v45, %s334_s27 }
  0x9c   :  { %v37_v17 = vadd.f32 %v36_v7, %v33_v1  ;;  %v38_v27 = vadd.f32 %v36_v7, %v34_v12 }
  0x9e   :  { %v64_v30 = vadd.f32 %v62_v16, %v37_v17  ;;  %v65_v38 = vadd.f32 %v63_v26, %v38_v27 }
  0x9f   :  { %206 = vrot.lane.b32.xlu1 %v201_v46, %s334_s27 }
 0x101   :  { %v217_v13 = vpop.permute.xlu0 %216 }
 0x102   :  { %v222_v14 = vadd.f32 %v217_v13, %v180_v9 }
 0x104   :  { %226 = vrot.lane.b32.xlu0 %v222_v14, %s334_s27 }
 0x105   :  { %v219_v23 = vpop.permute.xlu1 %218  ;;  %v73_v24 = vpop.permute.xlu0 %72 }
 0x106   :  { %v223_v28 = vadd.f32 %v219_v23, %v181_v22  ;;  %v78_v29 = vadd.f32 %v73_v24, %v44_v15 }
 0x108   :  { %228 = vrot.lane.b32.xlu1 %v223_v28, %s334_s27  ;;  %v125_v0 = vadd.f32 %v123_v21, %v78_v29 }
 0x109   :  { %v75_v35 = vpop.permute.xlu1 %74  ;;  %v111_v36 = vpop.permute.xlu0 %110 }
 0x10a   :  { %v116_v37 = vadd.f32 %v111_v36, %v64_v30  ;;  %v174_v39 = vadd.f32 %v172_v31, %v125_v0  ;;  %v79_v53 = vadd.f32 %v75_v35, %v45_v51 }
 0x10c   :  { %v165_v41 = vadd.f32 %v163_v34, %v116_v37  ;;  %v126_v55 = vadd.f32 %v124_v52, %v79_v53 }
 0x10d   :  { %v113_v43 = vpop.permute.xlu1 %112  ;;  %v205_v44 = vpop.permute.xlu0 %204 }
 0x10e   :  { %v117_v45 = vadd.f32 %v113_v43, %v65_v38  ;;  %v210_v46 = vadd.f32 %v205_v44, %v174_v39  ;;  %v196_v47 = vadd.f32 %v194_v40, %v165_v41  ;;  %v175_v58 = vadd.f32 %v173_v56, %v126_v55 }
 0x110   :  { %v166_v48 = vadd.f32 %v164_v42, %v117_v45  ;;  %v212_v49 = vadd.f32 %v210_v46, %v196_v47 }
 0x111   :  { %v207_v60 = vpop.permute.xlu1 %206 }
 0x112   :  { %v211_v61 = vadd.f32 %v207_v60, %v175_v58  ;;  %v197_v62 = vadd.f32 %v195_v59, %v166_v48 }
 0x114   :  { %v213_v2 = vadd.f32 %v211_v61, %v197_v62 }
 0x176   :  { %v227_v63 = vpop.permute.xlu0 %226 }
 0x177   :  { %v232_v1 = vadd.f32 %v227_v63, %v212_v49 }
 0x179   :  { %235 = vst.msk [vmem:[#allocation6] sm:$0xf] %vm234_vm0, %v232_v1 }
 0x17a   :  { %v229_v3 = vpop.permute.xlu1 %228 }
 0x17b   :  { %v233_v4 = vadd.f32 %v229_v3, %v213_v2 }
 0x17d   :  { %236 = vst.msk [vmem:[#allocation6 + $0x4] sm:$0xf] %vm234_vm0, %v233_v4 }
 0x17e   :  { %320 = shalt.err (!%p317_p9)
}
 0x17f   :  { %s337_s0 = smov 64   ;;  %s338_s6 = smov 4  }
 0x180   :  { %248 = dma.vmem_to_hbm [thread:$0]  %s243_s4, 128, %s488_s3, [#allocation4], %s337_s0, %s337_s0, %s338_s6  }
 0x181   :  { %331 = dma.done.wait [#allocation4], 128  }
 0x182   :  { %332 = vsyncadd [#allocation4], 4294967168 }
 0x183   :  { %252 = vsyncpa [#allocation4], 1 }
 0x184   :  { %253 = vsyncpa [#allocation5], 1 }

</bundles_post_ra>
